<compile_context>
chip_gen: v7x
topology: tpu7x:2x2x1
jax: 0.10.0
libtpu: 0.0.40
codegen_flags: <defaults>
</compile_context>

<pallas_src>
import jax
import jax.numpy as jnp
from jax import lax
from jax.experimental import pallas as pl
from jax.experimental.pallas import tpu as pltpu

KS = 7           # dense conv kernel size
PAD = KS // 2    # padding = 3
_LANE = 128


def _hardswish(v):
    return v * jnp.clip(v + 3.0, 0.0, 6.0) * (1.0 / 6.0)


def _hardsigmoid(v):
    return jnp.clip(v + 3.0, 0.0, 6.0) * (1.0 / 6.0)


def _conv7_as_matmul_operators(w_dense, H, W):
    """Build (2, H*W, H*W) f32 operators K with
         K[c, hi*W+wi, ho*W+wo] = w_dense[c, hi-ho+PAD, wi-wo+PAD]
    (zero outside the 7x7 window), so that
         conv7x7_pad3(f)[ho, wo] = sum_c  f_flat[c, :] @ K[c]."""
    ih = jnp.arange(H)
    oh = jnp.arange(H)
    iw = jnp.arange(W)
    ow = jnp.arange(W)
    dh = ih[:, None] - oh[None, :] + PAD                       # (H, H) [hi, ho]
    dw = iw[:, None] - ow[None, :] + PAD                       # (W, W) [wi, wo]
    vh = (dh >= 0) & (dh < KS)
    vw = (dw >= 0) & (dw < KS)
    dhc = jnp.clip(dh, 0, KS - 1)
    dwc = jnp.clip(dw, 0, KS - 1)
    k4 = w_dense.astype(jnp.float32)[:, dhc[:, :, None, None], dwc[None, None, :, :]]
    k4 = k4 * (vh[:, :, None, None] & vw[None, None, :, :]).astype(jnp.float32)
    # (c, hi, ho, wi, wo) -> (c, hi, wi, ho, wo) -> (c, H*W, H*W)
    return k4.transpose(0, 1, 3, 2, 4).reshape(2, H * W, H * W)


def spatial_attention_kernel(b_ref, w2_ref, kcat_ref, rep_ref, x_ref, o_ref, fcat_ref):
    # b_ref   : SMEM (2,)            [b_fc, b_dense]
    # w2_ref  : VMEM (2*NB, NB*C)    block-diag mean (rows 0:NB) / 1x1-conv (rows NB:) weights
    # kcat_ref: VMEM (2*HWp, HWp)    fused [Km; Kf] 7x7 conv-as-matmul operator
    # rep_ref : VMEM (NB*C, NB)      channel-repeat matrix (rep[b*C+c, b] = 1)
    # x_ref   : VMEM (NB*C, HWp)     lane-dense input slab (rows = batch-major, channel-minor)
    # o_ref   : VMEM (NB*C, HWp)     lane-dense output slab
    # fcat_ref: VMEM (NB, 2*HWp)     scratch: [mean | fc] assembled at aligned lane offsets
    nb = rep_ref.shape[1]
    hwp = x_ref.shape[1]
    b_fc = b_ref[0]
    b_dense = b_ref[1]

    # Batched channel-mean + 1x1 conv for ALL NB batches in one MXU contraction.
    xf = x_ref[...].astype(jnp.float32)                                    # (NB*C, HWp)
    f2 = jnp.dot(w2_ref[...], xf, preferred_element_type=jnp.float32)      # (2*NB, HWp)
    mean = f2[:nb, :]                                                      # (NB, HWp)
    fc = _hardswish(f2[nb:, :] + b_fc)                                     # (NB, HWp)

    # Fused 7x7 pad-3 conv over both feature channels: one (NB, 2*HWp) @ (2*HWp, HWp)
    # MXU matmul.  The [mean | fc] operand is assembled in VMEM at 128-aligned offsets.
    fcat_ref[:, :hwp] = mean
    fcat_ref[:, hwp:] = fc
    acc = jnp.dot(fcat_ref[...], kcat_ref[...],
                  preferred_element_type=jnp.float32) + b_dense            # (NB, HWp)
    attn = _hardsigmoid(acc)                                               # (NB, HWp)

    # Broadcast attn to every channel row with a tiny repeat matmul, then gate the
    # whole block with one dense, unmasked store.  bf16 inputs stay bf16 here.
    attn_full = jnp.dot(rep_ref[...], attn, preferred_element_type=jnp.float32)
    o_ref[...] = (x_ref[...] * attn_full.astype(o_ref.dtype)).astype(o_ref.dtype)


def _pick_batch_block(N, C, hwp, itemsize, target_bytes=4 << 20):
    """Largest divisor of N whose per-step x slab stays under target_bytes.

    Prefers divisors whose row count (NB*C) is a multiple of 8 (full sublane tiles).
    No N//2 cap: single-TC v5e/v6e benefit from fat steps; on v7x pass batch_block
    explicitly to keep >=2 grid steps for the two TensorCores."""
    per_batch = C * hwp * itemsize
    divisors = [d for d in range(1, N + 1) if N % d == 0]
    aligned = [d for d in divisors if (d * C) % 8 == 0 or d == N]
    cands = aligned if aligned else divisors
    fitting = [d for d in cands if d * per_batch <= target_bytes]
    return max(fitting) if fitting else min(cands)


def spatial_attention(x, w_fc, b_fc, w_dense, b_dense, *, batch_block=None):
    N, C, H, W = x.shape
    HW = H * W
    HWp = ((HW + _LANE - 1) // _LANE) * _LANE          # lane-pad spatial dim to 128

    dense_bytes = 2 * HWp * HWp * 4
    if dense_bytes > (24 << 20):
        # TODO(synk): switch to a banded / 49-shift conv formulation for large H*W;
        # the dense conv-as-matmul operator is O((H*W)^2) and would not fit VMEM.
        raise NotImplementedError("H*W too large for the dense conv-as-matmul operator")

    if batch_block is None:
        batch_block = _pick_batch_block(N, C, HWp, x.dtype.itemsize)
    NB = batch_block
    assert N % NB == 0, "batch_block must divide the batch size"
    ROWS = NB * C

    # ---- host-side parameter packing --------------------------------------
    eye = jnp.eye(NB, dtype=jnp.float32)
    w2 = jnp.concatenate(
        [jnp.kron(eye, jnp.full((1, C), 1.0 / C, dtype=jnp.float32)),     # mean rows
         jnp.kron(eye, w_fc.reshape(1, C).astype(jnp.float32))], axis=0)  # fc rows
    rep = jnp.kron(eye, jnp.ones((C, 1), dtype=jnp.float32))              # (NB*C, NB)

    k2 = _conv7_as_matmul_operators(w_dense, H, W)                        # (2, HW, HW)
    kcat = jnp.zeros((2 * HWp, HWp), dtype=jnp.float32)
    kcat = kcat.at[:HW, :HW].set(k2[0])
    kcat = kcat.at[HWp:HWp + HW, :HW].set(k2[1])

    b_all = jnp.stack([b_fc.reshape(()), b_dense.reshape(())]).astype(jnp.float32)

    x2 = x.reshape(N * C, HW)                 # contiguous, lane-dense layout
    if HWp != HW:
        x2 = jnp.pad(x2, ((0, 0), (0, HWp - HW)))

    # ---- VMEM budget (x/out double-buffered + grid-invariant operands) ----
    slab = ROWS * HWp * x.dtype.itemsize
    op_bytes = int(w2.size + rep.size + kcat.size) * 4
    vmem_limit = int(min(max(2 * 2 * slab + 2 * op_bytes + (4 << 20), 16 << 20), 100 << 20))

    out2 = pl.pallas_call(
        spatial_attention_kernel,
        out_shape=jax.ShapeDtypeStruct((N * C, HWp), x.dtype),
        grid_spec=pltpu.PrefetchScalarGridSpec(
            num_scalar_prefetch=0,
            grid=(N // NB,),
            in_specs=[
                pl.BlockSpec(memory_space=pltpu.MemorySpace.SMEM),        # b_all
                pl.BlockSpec((2 * NB, NB * C), lambda n: (0, 0)),         # w2 (invariant)
                pl.BlockSpec((2 * HWp, HWp), lambda n: (0, 0)),           # kcat (invariant)
                pl.BlockSpec((ROWS, NB), lambda n: (0, 0)),               # rep (invariant)
                pl.BlockSpec((ROWS, HWp), lambda n: (n, 0)),              # x slab
            ],
            out_specs=pl.BlockSpec((ROWS, HWp), lambda n: (n, 0)),
            scratch_shapes=[pltpu.VMEM((NB, 2 * HWp), jnp.float32)],      # [mean | fc]
        ),
        compiler_params=pltpu.CompilerParams(
            dimension_semantics=("parallel",),
            vmem_limit_bytes=vmem_limit,
        ),
    )(b_all, w2, kcat, rep, x2)

    if HWp != HW:
        out2 = out2[:, :HW]
    return out2.reshape(N, C, H, W)


def spatial_attention_ref(x, w_fc, b_fc, w_dense, b_dense):
    """Pure-JAX reference mirroring the PyTorch forward (explicit tap loop, f32)."""
    N, C, H, W = x.shape
    xf = x.astype(jnp.float32)
    mean_c = xf.mean(axis=1)                                              # (N, H, W)
    fc_pre = jnp.einsum("nchw,c->nhw", xf, w_fc,
                        precision=lax.Precision.HIGHEST) + b_fc[0]
    fc = _hardswish(fc_pre)
    f = jnp.stack([mean_c, fc], axis=1)                                   # (N, 2, H, W)
    fpad = jnp.pad(f, ((0, 0), (0, 0), (PAD, PAD), (PAD, PAD)))
    acc = jnp.full((N, H, W), b_dense[0], dtype=jnp.float32)
    for c in range(2):
        for dh in range(KS):
            for dw in range(KS):
                acc = acc + w_dense[c, dh, dw] * fpad[:, c, dh:dh + H, dw:dw + W]
    attn = _hardsigmoid(acc)
    return x * attn[:, None]


if __name__ == "__main__":
    key = jax.random.PRNGKey(0)
    k_x, k_wfc, k_bfc, k_wd, k_bd = jax.random.split(key, 5)

    N, C, H, W = 2, 4, 16, 16
    x = jax.random.normal(k_x, (N, C, H, W), dtype=jnp.float32)

    # Deterministic synthetic params (shapes per nn.Conv2d in the module).
    w_fc = jax.random.normal(k_wfc, (C,), dtype=jnp.float32) * 0.5            # Conv2d(C,1,1) weight
    b_fc = jax.random.normal(k_bfc, (1,), dtype=jnp.float32) * 0.1            # Conv2d(C,1,1) bias
    w_dense = jax.random.normal(k_wd, (2, KS, KS), dtype=jnp.float32) * 0.1   # Conv2d(2,1,7) weight
    b_dense = jax.random.normal(k_bd, (1,), dtype=jnp.float32) * 0.1          # Conv2d(2,1,7) bias

    out = spatial_attention(x, w_fc, b_fc, w_dense, b_dense)
    out = jax.block_until_ready(out)

    ref = spatial_attention_ref(x, w_fc, b_fc, w_dense, b_dense)
    assert out.shape == (N, C, H, W)
    # Default-precision (single-pass) MXU matmuls vs. the exact-f32 elementwise
    # tap-loop reference: tolerance loosened per the performance review.
    max_err = float(jnp.max(jnp.abs(out - ref)))
    assert jnp.allclose(out, ref, rtol=5e-2, atol=5e-2), max_err

    print("KERNEL_OK")
</pallas_src>

<mosaic_0001>
module attributes {stable_mosaic.version = 11 : i64} {
  func.func @spatial_attention_kernel(%arg0: i32, %arg1: memref<2xf32, #tpu.memory_space<smem>>, %arg2: memref<4x8xf32, #tpu.memory_space<vmem>>, %arg3: memref<512x256xf32, #tpu.memory_space<vmem>>, %arg4: memref<8x2xf32, #tpu.memory_space<vmem>>, %arg5: memref<8x256xf32, #tpu.memory_space<vmem>>, %arg6: memref<8x256xf32, #tpu.memory_space<vmem>>, %arg7: memref<2x512xf32, #tpu.memory_space<vmem>>) attributes {dimension_semantics = [#tpu.dimension_semantics<parallel>], iteration_bounds = array<i64: 1>, scalar_prefetch = 0 : i64, scratch_operands = 1 : i64, tpu.core_type = #tpu.core_type<tc>, window_params = [{transform_indices = @transform_0, window_bounds = array<i64: 2>}, {pipeline_mode = #tpu.pipeline_mode<synchronous>, transform_indices = @transform_1, window_bounds = array<i64: 4, 8>}, {pipeline_mode = #tpu.pipeline_mode<synchronous>, transform_indices = @transform_2, window_bounds = array<i64: 512, 256>}, {pipeline_mode = #tpu.pipeline_mode<synchronous>, transform_indices = @transform_3, window_bounds = array<i64: 8, 2>}, {transform_indices = @transform_4, window_bounds = array<i64: 8, 256>}, {transform_indices = @transform_5, window_bounds = array<i64: 8, 256>}]} {
    %c0 = arith.constant 0 : index
    %0 = memref.load %arg1[%c0] : memref<2xf32, #tpu.memory_space<smem>>
    %c1 = arith.constant 1 : index
    %1 = memref.load %arg1[%c1] : memref<2xf32, #tpu.memory_space<smem>>
    %c0_0 = arith.constant 0 : index
    %c0_1 = arith.constant 0 : index
    %2 = vector.load %arg5[%c0_0, %c0_1] : memref<8x256xf32, #tpu.memory_space<vmem>>, vector<8x256xf32>
    %c0_2 = arith.constant 0 : index
    %c0_3 = arith.constant 0 : index
    %3 = vector.load %arg2[%c0_2, %c0_3] : memref<4x8xf32, #tpu.memory_space<vmem>>, vector<4x8xf32>
    %cst = arith.constant dense<0.000000e+00> : vector<4x256xf32>
    %4 = tpu.matmul %3, %2, %cst {dimension_numbers = #tpu.dot_dimension_numbers<[1], [0], [0], [1], [0, 0, 1, 1], [], []>} : vector<4x8xf32>, vector<8x256xf32>, vector<4x256xf32> -> vector<4x256xf32>
    %5 = vector.extract_strided_slice %4 {offsets = [0, 0], sizes = [2, 256], strides = [1, 1]} : vector<4x256xf32> to vector<2x256xf32>
    %6 = vector.extract_strided_slice %4 {offsets = [2, 0], sizes = [2, 256], strides = [1, 1]} : vector<4x256xf32> to vector<2x256xf32>
    %7 = vector.broadcast %0 : f32 to vector<2x256xf32>
    %8 = arith.addf %6, %7 : vector<2x256xf32>
    %cst_4 = arith.constant 3.000000e+00 : f32
    %9 = vector.broadcast %cst_4 : f32 to vector<2x256xf32>
    %10 = arith.addf %8, %9 : vector<2x256xf32>
    %cst_5 = arith.constant 0.000000e+00 : f32
    %cst_6 = arith.constant 6.000000e+00 : f32
    %11 = vector.broadcast %cst_5 : f32 to vector<2x256xf32>
    %12 = arith.maximumf %11, %10 : vector<2x256xf32>
    %13 = vector.broadcast %cst_6 : f32 to vector<2x256xf32>
    %14 = arith.minimumf %13, %12 : vector<2x256xf32>
    %15 = arith.mulf %8, %14 : vector<2x256xf32>
    %cst_7 = arith.constant 0.166666672 : f32
    %16 = vector.broadcast %cst_7 : f32 to vector<2x256xf32>
    %17 = arith.mulf %15, %16 : vector<2x256xf32>
    %c0_8 = arith.constant 0 : index
    %c0_9 = arith.constant 0 : index
    %18 = vector.load %arg7[%c0_8, %c0_9] : memref<2x512xf32, #tpu.memory_space<vmem>>, vector<2x256xf32>
    tpu.vector_store %arg7[%c0_8, %c0_9], %5 {strides = array<i32>} : memref<2x512xf32, #tpu.memory_space<vmem>>, vector<2x256xf32>,
    %c0_10 = arith.constant 0 : index
    %c256 = arith.constant 256 : index
    %19 = vector.load %arg7[%c0_10, %c256] : memref<2x512xf32, #tpu.memory_space<vmem>>, vector<2x256xf32>
    tpu.vector_store %arg7[%c0_10, %c256], %17 {strides = array<i32>} : memref<2x512xf32, #tpu.memory_space<vmem>>, vector<2x256xf32>,
    %c0_11 = arith.constant 0 : index
    %c0_12 = arith.constant 0 : index
    %20 = vector.load %arg7[%c0_11, %c0_12] : memref<2x512xf32, #tpu.memory_space<vmem>>, vector<2x512xf32>
    %c0_13 = arith.constant 0 : index
    %c0_14 = arith.constant 0 : index
    %21 = vector.load %arg3[%c0_13, %c0_14] : memref<512x256xf32, #tpu.memory_space<vmem>>, vector<512x256xf32>
    %cst_15 = arith.constant dense<0.000000e+00> : vector<2x256xf32>
    %22 = tpu.matmul %20, %21, %cst_15 {dimension_numbers = #tpu.dot_dimension_numbers<[1], [0], [0], [1], [0, 0, 1, 1], [], []>} : vector<2x512xf32>, vector<512x256xf32>, vector<2x256xf32> -> vector<2x256xf32>
    %23 = vector.broadcast %1 : f32 to vector<2x256xf32>
    %24 = arith.addf %22, %23 : vector<2x256xf32>
    %cst_16 = arith.constant 3.000000e+00 : f32
    %25 = vector.broadcast %cst_16 : f32 to vector<2x256xf32>
    %26 = arith.addf %24, %25 : vector<2x256xf32>
    %cst_17 = arith.constant 0.000000e+00 : f32
    %cst_18 = arith.constant 6.000000e+00 : f32
    %27 = vector.broadcast %cst_17 : f32 to vector<2x256xf32>
    %28 = arith.maximumf %27, %26 : vector<2x256xf32>
    %29 = vector.broadcast %cst_18 : f32 to vector<2x256xf32>
    %30 = arith.minimumf %29, %28 : vector<2x256xf32>
    %cst_19 = arith.constant 0.166666672 : f32
    %31 = vector.broadcast %cst_19 : f32 to vector<2x256xf32>
    %32 = arith.mulf %30, %31 : vector<2x256xf32>
    %c0_20 = arith.constant 0 : index
    %c0_21 = arith.constant 0 : index
    %33 = vector.load %arg4[%c0_20, %c0_21] : memref<8x2xf32, #tpu.memory_space<vmem>>, vector<8x2xf32>
    %cst_22 = arith.constant dense<0.000000e+00> : vector<8x256xf32>
    %34 = tpu.matmul %33, %32, %cst_22 {dimension_numbers = #tpu.dot_dimension_numbers<[1], [0], [0], [1], [0, 0, 1, 1], [], []>} : vector<8x2xf32>, vector<2x256xf32>, vector<8x256xf32> -> vector<8x256xf32>
    %c0_23 = arith.constant 0 : index
    %c0_24 = arith.constant 0 : index
    %35 = vector.load %arg5[%c0_23, %c0_24] : memref<8x256xf32, #tpu.memory_space<vmem>>, vector<8x256xf32>
    %36 = arith.mulf %35, %34 : vector<8x256xf32>
    %c0_25 = arith.constant 0 : index
    %c0_26 = arith.constant 0 : index
    %37 = vector.load %arg6[%c0_25, %c0_26] : memref<8x256xf32, #tpu.memory_space<vmem>>, vector<8x256xf32>
    tpu.vector_store %arg6[%c0_25, %c0_26], %36 {strides = array<i32>} : memref<8x256xf32, #tpu.memory_space<vmem>>, vector<8x256xf32>,
    return
  }
  func.func @transform_0(%arg0: i32) -> i32 {
    %c0_i32 = arith.constant 0 : i32
    %c0_i32_0 = arith.constant 0 : i32
    return %c0_i32 : i32
  }
  func.func @transform_1(%arg0: i32) -> (i32, i32) {
    %c0_i32 = arith.constant 0 : i32
    %c0_i32_0 = arith.constant 0 : i32
    %c0_i32_1 = arith.constant 0 : i32
    return %c0_i32, %c0_i32_0 : i32, i32
  }
  func.func @transform_2(%arg0: i32) -> (i32, i32) {
    %c0_i32 = arith.constant 0 : i32
    %c0_i32_0 = arith.constant 0 : i32
    %c0_i32_1 = arith.constant 0 : i32
    return %c0_i32, %c0_i32_0 : i32, i32
  }
  func.func @transform_3(%arg0: i32) -> (i32, i32) {
    %c0_i32 = arith.constant 0 : i32
    %c0_i32_0 = arith.constant 0 : i32
    %c0_i32_1 = arith.constant 0 : i32
    return %c0_i32, %c0_i32_0 : i32, i32
  }
  func.func @transform_4(%arg0: i32) -> (i32, i32) {
    %c0_i32 = arith.constant 0 : i32
    %c0_i32_0 = arith.constant 0 : i32
    return %arg0, %c0_i32 : i32, i32
  }
  func.func @transform_5(%arg0: i32) -> (i32, i32) {
    %c0_i32 = arith.constant 0 : i32
    %c0_i32_0 = arith.constant 0 : i32
    return %arg0, %c0_i32 : i32, i32
  }
}

</mosaic_0001>

<bundles_post_ra>
// kernel: tpu_custom_call.1
= control target key start
LH: loop header
LB: loop body
LE: loop exit
PB: predicated region body
PF: predicated region fallthrough
CT: control target
= control target key end

     0   :  { %10 = vsyncpa [#allocation6], 0  ;;  %s867_s0 = inlined_call_operand.vmem [shape: f32[2], index: 0, kind: input, shape index: {}]   ;;  %s868_s1 = inlined_call_operand.vmem [shape: f32[4,8], index: 1, kind: input, shape index: {}]   ;;  %s869_s2 = inlined_call_operand.hbm [shape: f32[512,256], index: 2, kind: input, shape index: {}]   ;;  %s870_s3 = inlined_call_operand.vmem [shape: f32[8,2], index: 3, kind: input, shape index: {}]   ;;  %s871_s4 = inlined_call_operand.vmem [shape: f32[8,256], index: 4, kind: input, shape index: {}]   ;;  %s872_s5 = inlined_call_operand.hbm [shape: f32[8,256], index: 5, kind: output, shape index: {}]  }
   0x1   :  { %11 = vsyncpa [#allocation4], 0 }
   0x2   :  { %12 = vsyncpa [#allocation5], 0  ;;  %s19_s20 = sshll.u32 %s867_s0, 4  ;;  %s20_s20 = int_to_ptr.vmem [resolvable:$true] %s19_s20 }
   0x3   :  { %s719_s21 = scalar_lea.vmem %s20_s20, 16  ;;  %p724_p1 = scmp.lt.s32.totalorder %s20_s20, %s20_s20 }
   0x4   :  { %p720_p0 = scmp.ne.s32.totalorder %s20_s20, %s719_s21  ;;  %p725_p2 = scmp.lt.s32.totalorder %s719_s21, %s719_s21 }
   0x6   :  { %p726_p3 = por %p725_p2, %p724_p1 }
   0x8   :  { %p727_p4 = pnand %p726_p3, %p720_p0 }
   0xa   :  { %730 = shalt.err (!%p727_p4)
}
   0xb   :  { %s781_s22 = smov [#allocation3]   ;;  %s782_s23 = smov [#allocation7]  }
   0xc   :  { %22 = dma.vmem_to_smem %s20_s20, 16, %s781_s22, [#allocation6]  }
   0xd   :  { %s30_s24 = sshll.u32 %s782_s23, 4  ;;  %s731_s27 = scalar_lea.hbm %s869_s2, 16384  ;;  %s31_s24 = int_to_ptr.vmem [resolvable:$true] %s30_s24 }
   0xe   :  { %p732_p5 = scmp.ne.s32.totalorder %s869_s2, %s731_s27  ;;  %p735_p6 = scmp.lt.u32.totalorder %s731_s27, %s869_s2 }
  0x10   :  { %p737_p7 = pnand %p735_p6, %p732_p5 }
  0x12   :  { %740 = shalt.err (!%p737_p7)
}
  0x13   :  { %s741_s6 = scalar_lea.vmem %s31_s24, 16384  ;;  %p746_p9 = scmp.lt.s32.totalorder %s31_s24, %s31_s24 }
  0x14   :  { %p742_p8 = scmp.ne.s32.totalorder %s31_s24, %s741_s6  ;;  %p747_p10 = scmp.lt.s32.totalorder %s741_s6, %s741_s6 }
  0x16   :  { %p748_p11 = por %p747_p10, %p746_p9 }
  0x18   :  { %p749_p12 = pnand %p748_p11, %p742_p8 }
  0x1a   :  { %752 = shalt.err (!%p749_p12)
}
  0x1b   :  { %s783_s7 = smov 256   ;;  %s784_s8 = smov 16  }
  0x1c   :  { %36 = dma.hbm_to_vmem [thread:$0]  %s869_s2, 16384, %s31_s24, [#allocation4], %s783_s7, %s783_s7, %s784_s8  }
  0x1d   :  { %775 = dma.done.wait [#allocation6], 16  }
  0x1e   :  { %776 = vsyncadd [#allocation6], 4294967280 }
  0x1f   :  { %777 = dma.done.wait [#allocation4], 16384  }
  0x20   :  { %778 = vsyncadd [#allocation4], 4294950912 }
  0x21   :  { %47 = sfence }
  0x22   :  { %v836_v0 = vld [vmem:[%s871_s4 + $0x8] sm:$0xff]  ;;  %v841_v1 = vld [vmem:[%s871_s4] sm:$0xff]  ;;  %vm53_vm0 = vcmask 64512   ;;  %v785_v3 = vmov 0.0   ;;  %v168_v4 = vld [vmem:[#allocation7 + $0x8] sm:$0xff]  ;;  %s573_s2 = sld [smem:[#allocation3 + $0x1]] }
  0x23   :  { %v52_v2 = vld [vmem:[%s868_s1] sm:$0xf]  ;;  %57 = vmatprep.subr.mxu1 %v836_v0  ;;  %121 = vmatprep.mubr.f32.mxu1 %v785_v3  ;;  %v167_v6 = vld [vmem:[#allocation7] sm:$0xff]  ;;  %v169_v8 = vld [vmem:[#allocation7 + $0x10] sm:$0xff]  ;;  %s48_s1 = sld [smem:[#allocation3]]  ;;  %vm473_vm1 = vcmask 1041408  }
  0x24   :  { %v170_v5 = vld [vmem:[#allocation7 + $0x18] sm:$0xff]  ;;  %58 = vmatpush1.msra.mxu1 %v841_v1  ;;  %v232_v9 = vld [vmem:[#allocation7 + $0x208] sm:$0xff]  ;;  %v581_v11 = vpack.c.bf16 %v169_v8, %v167_v6  ;;  %v231_v13 = vld [vmem:[#allocation7 + $0x200] sm:$0xff]  ;;  %vm469_vm2 = vcmask 15360   ;;  %s787_s18 = smov [#allocation8]  }
  0x25   :  { %v579_v7 = vpack.c.bf16 %v170_v5, %v168_v4  ;;  %v234_v10 = vld [vmem:[#allocation7 + $0x218] sm:$0xff]  ;;  %574 = vmatmul.mubr.msk.f32.vlgmr.msra.gmra.mrb[0].mxu1 %vm53_vm0, %v52_v2  ;;  %v233_v14 = vld [vmem:[#allocation7 + $0x210] sm:$0xff]  ;;  %v172_v15 = vld [vmem:[#allocation7 + $0x28] sm:$0xff]  ;;  %s563_s19 = sshll.u32 %s787_s18, 4  ;;  %s564_s19 = int_to_ptr.vmem [resolvable:$true] %s563_s19 }
  0x26   :  { %v643_v12 = vpack.c.bf16 %v234_v10, %v232_v9  ;;  %v645_v16 = vpack.c.bf16 %v233_v14, %v231_v13  ;;  %v174_v17 = vld [vmem:[#allocation7 + $0x38] sm:$0xff]  ;;  %v171_v18 = vld [vmem:[#allocation7 + $0x20] sm:$0xff]  ;;  %v173_v19 = vld [vmem:[#allocation7 + $0x30] sm:$0xff]  ;;  %s753_s20 = scalar_lea.vmem %s564_s19, 256  ;;  %p758_p0 = scmp.lt.s32.totalorder %s564_s19, %s564_s19 }
  0x27   :  { %580 = vmatprep.subr.bf16.mxu0 %v579_v7  ;;  %v583_v20 = vpack.c.bf16 %v174_v17, %v172_v15  ;;  %v585_v21 = vpack.c.bf16 %v173_v19, %v171_v18  ;;  %v236_v22 = vld [vmem:[#allocation7 + $0x228] sm:$0xff]  ;;  %v238_v23 = vld [vmem:[#allocation7 + $0x238] sm:$0xff]  ;;  %v235_v24 = vld [vmem:[#allocation7 + $0x220] sm:$0xff]  ;;  %p754_p13 = scmp.ne.s32.totalorder %s564_s19, %s753_s20  ;;  %p759_p1 = scmp.lt.s32.totalorder %s753_s20, %s753_s20 }
  0x28   :  { %582 = vmatpush1.bf16.msra.mxu0 %v581_v11  ;;  %644 = vmatprep.subr.bf16.mxu1 %v643_v12  ;;  %v647_v25 = vpack.c.bf16 %v238_v23, %v236_v22  ;;  %v237_v26 = vld [vmem:[#allocation7 + $0x230] sm:$0xff]  ;;  %v176_v27 = vld [vmem:[#allocation7 + $0x48] sm:$0xff]  ;;  %v178_v28 = vld [vmem:[#allocation7 + $0x58] sm:$0xff] }
  0x29   :  { %646 = vmatpush1.bf16.msra.mxu1 %v645_v16  ;;  %584 = vmatprep.subr.bf16.mxu0 %v583_v20  ;;  %v649_v29 = vpack.c.bf16 %v237_v26, %v235_v24  ;;  %v587_v30 = vpack.c.bf16 %v178_v28, %v176_v27  ;;  %v175_v31 = vld [vmem:[#allocation7 + $0x40] sm:$0xff]  ;;  %v177_v32 = vld [vmem:[#allocation7 + $0x50] sm:$0xff]  ;;  %v240_v33 = vld [vmem:[#allocation7 + $0x248] sm:$0xff]  ;;  %p760_p2 = por %p759_p1, %p758_p0 }
  0x2a   :  { %648 = vmatprep.subr.bf16.mxu1 %v647_v25  ;;  %v242_v34 = vld [vmem:[#allocation7 + $0x258] sm:$0xff]  ;;  %v239_v35 = vld [vmem:[#allocation7 + $0x240] sm:$0xff]  ;;  %v241_v36 = vld [vmem:[#allocation7 + $0x250] sm:$0xff]  ;;  %v589_v37 = vpack.c.bf16 %v177_v32, %v175_v31 }
  0x2b   :  { %v651_v38 = vpack.c.bf16 %v242_v34, %v240_v33  ;;  %v180_v39 = vld [vmem:[#allocation7 + $0x68] sm:$0xff]  ;;  %v182_v40 = vld [vmem:[#allocation7 + $0x78] sm:$0xff]  ;;  %v179_v41 = vld [vmem:[#allocation7 + $0x60] sm:$0xff]  ;;  %v653_v42 = vpack.c.bf16 %v241_v36, %v239_v35  ;;  %p761_p3 = pnand %p760_p2, %p754_p13 }
  0x2c   :  { %586 = vmatpush1.bf16.msra.mxu0 %v585_v21  ;;  %v591_v43 = vpack.c.bf16 %v182_v40, %v180_v39  ;;  %v181_v44 = vld [vmem:[#allocation7 + $0x70] sm:$0xff]  ;;  %v244_v45 = vld [vmem:[#allocation7 + $0x268] sm:$0xff]  ;;  %v246_v46 = vld [vmem:[#allocation7 + $0x278] sm:$0xff] }
  0x2d   :  { %650 = vmatpush1.bf16.msra.mxu1 %v649_v29  ;;  %588 = vmatprep.subr.bf16.mxu0 %v587_v30  ;;  %v655_v47 = vpack.c.bf16 %v246_v46, %v244_v45  ;;  %v243_v48 = vld [vmem:[#allocation7 + $0x260] sm:$0xff]  ;;  %v245_v49 = vld [vmem:[#allocation7 + $0x270] sm:$0xff]  ;;  %v184_v50 = vld [vmem:[#allocation7 + $0x88] sm:$0xff]  ;;  %v593_v52 = vpack.c.bf16 %v181_v44, %v179_v41 }
  0x2e   :  { %652 = vmatprep.subr.bf16.mxu1 %v651_v38  ;;  %v186_v51 = vld [vmem:[#allocation7 + $0x98] sm:$0xff]  ;;  %v248_v53 = vld [vmem:[#allocation7 + $0x288] sm:$0xff]  ;;  %v657_v55 = vpack.c.bf16 %v245_v49, %v243_v48  ;;  %v183_v57 = vld [vmem:[#allocation7 + $0x80] sm:$0xff] }
  0x2f   :  { %v250_v54 = vld [vmem:[#allocation7 + $0x298] sm:$0xff]  ;;  %v595_v56 = vpack.c.bf16 %v186_v51, %v184_v50  ;;  %v185_v58 = vld [vmem:[#allocation7 + $0x90] sm:$0xff]  ;;  %v247_v59 = vld [vmem:[#allocation7 + $0x280] sm:$0xff] }
  0x30   :  { %590 = vmatpush1.bf16.msra.mxu0 %v589_v37  ;;  %v659_v60 = vpack.c.bf16 %v250_v54, %v248_v53  ;;  %v249_v61 = vld [vmem:[#allocation7 + $0x290] sm:$0xff]  ;;  %v188_v62 = vld [vmem:[#allocation7 + $0xa8] sm:$0xff]  ;;  %v190_v63 = vld [vmem:[#allocation7 + $0xb8] sm:$0xff]  ;;  %v597_v5 = vpack.c.bf16 %v185_v58, %v183_v57 }
  0x31   :  { %654 = vmatpush1.bf16.msra.mxu1 %v653_v42  ;;  %592 = vmatprep.subr.bf16.mxu0 %v591_v43  ;;  %v252_v2 = vld [vmem:[#allocation7 + $0x2a8] sm:$0xff]  ;;  %v254_v4 = vld [vmem:[#allocation7 + $0x2b8] sm:$0xff]  ;;  %v661_v6 = vpack.c.bf16 %v249_v61, %v247_v59  ;;  %v599_v7 = vpack.c.bf16 %v190_v63, %v188_v62  ;;  %v187_v8 = vld [vmem:[#allocation7 + $0xa0] sm:$0xff] }
  0x32   :  { %656 = vmatprep.subr.bf16.mxu1 %v655_v47  ;;  %v189_v9 = vld [vmem:[#allocation7 + $0xb0] sm:$0xff]  ;;  %v251_v10 = vld [vmem:[#allocation7 + $0x2a0] sm:$0xff]  ;;  %v663_v11 = vpack.c.bf16 %v254_v4, %v252_v2  ;;  %v192_v13 = vld [vmem:[#allocation7 + $0xc8] sm:$0xff] }
  0x33   :  { %v253_v12 = vld [vmem:[#allocation7 + $0x2b0] sm:$0xff]  ;;  %v194_v14 = vld [vmem:[#allocation7 + $0xd8] sm:$0xff]  ;;  %v256_v15 = vld [vmem:[#allocation7 + $0x2c8] sm:$0xff]  ;;  %v601_v17 = vpack.c.bf16 %v189_v9, %v187_v8 }
  0x34   :  { %594 = vmatpush1.bf16.msra.mxu0 %v593_v52  ;;  %v258_v16 = vld [vmem:[#allocation7 + $0x2d8] sm:$0xff]  ;;  %v665_v18 = vpack.c.bf16 %v253_v12, %v251_v10  ;;  %v603_v19 = vpack.c.bf16 %v194_v14, %v192_v13  ;;  %v191_v20 = vld [vmem:[#allocation7 + $0xc0] sm:$0xff]  ;;  %v193_v21 = vld [vmem:[#allocation7 + $0xd0] sm:$0xff] }
  0x35   :  { %658 = vmatpush1.bf16.msra.mxu1 %v657_v55  ;;  %596 = vmatprep.subr.bf16.mxu0 %v595_v56  ;;  %v255_v22 = vld [vmem:[#allocation7 + $0x2c0] sm:$0xff]  ;;  %v667_v23 = vpack.c.bf16 %v258_v16, %v256_v15  ;;  %v257_v24 = vld [vmem:[#allocation7 + $0x2d0] sm:$0xff]  ;;  %v196_v25 = vld [vmem:[#allocation7 + $0xe8] sm:$0xff]  ;;  %v605_v29 = vpack.c.bf16 %v193_v21, %v191_v20 }
  0x36   :  { %660 = vmatprep.subr.bf16.mxu1 %v659_v60  ;;  %v198_v26 = vld [vmem:[#allocation7 + $0xf8] sm:$0xff]  ;;  %v260_v27 = vld [vmem:[#allocation7 + $0x2e8] sm:$0xff]  ;;  %v669_v30 = vpack.c.bf16 %v257_v24, %v255_v22  ;;  %v195_v32 = vld [vmem:[#allocation7 + $0xe0] sm:$0xff] }
  0x37   :  { %v262_v28 = vld [vmem:[#allocation7 + $0x2f8] sm:$0xff]  ;;  %v607_v31 = vpack.c.bf16 %v198_v26, %v196_v25  ;;  %v197_v33 = vld [vmem:[#allocation7 + $0xf0] sm:$0xff]  ;;  %v259_v36 = vld [vmem:[#allocation7 + $0x2e0] sm:$0xff] }
  0x38   :  { %598 = vmatpush1.bf16.msra.mxu0 %v597_v5  ;;  %v671_v34 = vpack.c.bf16 %v262_v28, %v260_v27  ;;  %v609_v35 = vpack.c.bf16 %v197_v33, %v195_v32  ;;  %v261_v37 = vld [vmem:[#allocation7 + $0x2f0] sm:$0xff]  ;;  %v200_v39 = vld [vmem:[#allocation7 + $0x108] sm:$0xff]  ;;  %v202_v40 = vld [vmem:[#allocation7 + $0x118] sm:$0xff] }
  0x39   :  { %662 = vmatpush1.bf16.msra.mxu1 %v661_v6  ;;  %600 = vmatprep.subr.bf16.mxu0 %v599_v7  ;;  %v673_v38 = vpack.c.bf16 %v261_v37, %v259_v36  ;;  %v611_v41 = vpack.c.bf16 %v202_v40, %v200_v39  ;;  %v199_v42 = vld [vmem:[#allocation7 + $0x100] sm:$0xff]  ;;  %v201_v43 = vld [vmem:[#allocation7 + $0x110] sm:$0xff]  ;;  %v264_v45 = vld [vmem:[#allocation7 + $0x308] sm:$0xff] }
  0x3a   :  { %664 = vmatprep.subr.bf16.mxu1 %v663_v11  ;;  %v613_v44 = vpack.c.bf16 %v201_v43, %v199_v42  ;;  %v266_v46 = vld [vmem:[#allocation7 + $0x318] sm:$0xff]  ;;  %v263_v48 = vld [vmem:[#allocation7 + $0x300] sm:$0xff]  ;;  %v265_v49 = vld [vmem:[#allocation7 + $0x310] sm:$0xff] }
  0x3b   :  { %v675_v47 = vpack.c.bf16 %v266_v46, %v264_v45  ;;  %v677_v50 = vpack.c.bf16 %v265_v49, %v263_v48  ;;  %v204_v51 = vld [vmem:[#allocation7 + $0x128] sm:$0xff]  ;;  %v206_v52 = vld [vmem:[#allocation7 + $0x138] sm:$0xff]  ;;  %v203_v54 = vld [vmem:[#allocation7 + $0x120] sm:$0xff] }
  0x3c   :  { %602 = vmatpush1.bf16.msra.mxu0 %v601_v17  ;;  %v615_v53 = vpack.c.bf16 %v206_v52, %v204_v51  ;;  %v205_v55 = vld [vmem:[#allocation7 + $0x130] sm:$0xff]  ;;  %v268_v57 = vld [vmem:[#allocation7 + $0x328] sm:$0xff]  ;;  %v270_v58 = vld [vmem:[#allocation7 + $0x338] sm:$0xff] }
  0x3d   :  { %666 = vmatpush1.bf16.msra.mxu1 %v665_v18  ;;  %604 = vmatprep.subr.bf16.mxu0 %v603_v19  ;;  %v617_v56 = vpack.c.bf16 %v205_v55, %v203_v54  ;;  %v679_v59 = vpack.c.bf16 %v270_v58, %v268_v57  ;;  %v267_v60 = vld [vmem:[#allocation7 + $0x320] sm:$0xff]  ;;  %v269_v61 = vld [vmem:[#allocation7 + $0x330] sm:$0xff]  ;;  %v208_v63 = vld [vmem:[#allocation7 + $0x148] sm:$0xff] }
  0x3e   :  { %668 = vmatprep.subr.bf16.mxu1 %v667_v23  ;;  %v681_v62 = vpack.c.bf16 %v269_v61, %v267_v60  ;;  %v210_v2 = vld [vmem:[#allocation7 + $0x158] sm:$0xff]  ;;  %v207_v5 = vld [vmem:[#allocation7 + $0x140] sm:$0xff]  ;;  %v209_v6 = vld [vmem:[#allocation7 + $0x150] sm:$0xff] }
  0x3f   :  { %v619_v4 = vpack.c.bf16 %v210_v2, %v208_v63  ;;  %v621_v7 = vpack.c.bf16 %v209_v6, %v207_v5  ;;  %v272_v8 = vld [vmem:[#allocation7 + $0x348] sm:$0xff]  ;;  %v274_v9 = vld [vmem:[#allocation7 + $0x358] sm:$0xff]  ;;  %v271_v11 = vld [vmem:[#allocation7 + $0x340] sm:$0xff] }
  0x40   :  { %606 = vmatpush1.bf16.msra.mxu0 %v605_v29  ;;  %v683_v10 = vpack.c.bf16 %v274_v9, %v272_v8  ;;  %v273_v12 = vld [vmem:[#allocation7 + $0x350] sm:$0xff]  ;;  %v212_v14 = vld [vmem:[#allocation7 + $0x168] sm:$0xff]  ;;  %v214_v15 = vld [vmem:[#allocation7 + $0x178] sm:$0xff] }
  0x41   :  { %670 = vmatpush1.bf16.msra.mxu1 %v669_v30  ;;  %608 = vmatprep.subr.bf16.mxu0 %v607_v31  ;;  %v685_v13 = vpack.c.bf16 %v273_v12, %v271_v11  ;;  %v623_v16 = vpack.c.bf16 %v214_v15, %v212_v14  ;;  %v211_v17 = vld [vmem:[#allocation7 + $0x160] sm:$0xff]  ;;  %v213_v18 = vld [vmem:[#allocation7 + $0x170] sm:$0xff]  ;;  %v276_v20 = vld [vmem:[#allocation7 + $0x368] sm:$0xff] }
  0x42   :  { %672 = vmatprep.subr.bf16.mxu1 %v671_v34  ;;  %v625_v19 = vpack.c.bf16 %v213_v18, %v211_v17  ;;  %v278_v21 = vld [vmem:[#allocation7 + $0x378] sm:$0xff]  ;;  %v275_v23 = vld [vmem:[#allocation7 + $0x360] sm:$0xff]  ;;  %v277_v24 = vld [vmem:[#allocation7 + $0x370] sm:$0xff] }
  0x43   :  { %v687_v22 = vpack.c.bf16 %v278_v21, %v276_v20  ;;  %v689_v25 = vpack.c.bf16 %v277_v24, %v275_v23  ;;  %v216_v26 = vld [vmem:[#allocation7 + $0x188] sm:$0xff]  ;;  %v218_v27 = vld [vmem:[#allocation7 + $0x198] sm:$0xff]  ;;  %v215_v28 = vld [vmem:[#allocation7 + $0x180] sm:$0xff]  ;;  %v786_v21 = vmov 1983009808   ;;  %v159_v23 = vlaneseq }
  0x44   :  { %610 = vmatpush1.bf16.msra.mxu0 %v609_v35  ;;  %v627_v29 = vpack.c.bf16 %v218_v27, %v216_v26  ;;  %v217_v30 = vld [vmem:[#allocation7 + $0x190] sm:$0xff]  ;;  %v280_v31 = vld [vmem:[#allocation7 + $0x388] sm:$0xff]  ;;  %v282_v32 = vld [vmem:[#allocation7 + $0x398] sm:$0xff] }
  0x45   :  { %674 = vmatpush1.bf16.msra.mxu1 %v673_v38  ;;  %612 = vmatprep.subr.bf16.mxu0 %v611_v41  ;;  %v629_v33 = vpack.c.bf16 %v217_v30, %v215_v28  ;;  %v691_v34 = vpack.c.bf16 %v282_v32, %v280_v31  ;;  %v279_v35 = vld [vmem:[#allocation7 + $0x380] sm:$0xff]  ;;  %v281_v36 = vld [vmem:[#allocation7 + $0x390] sm:$0xff]  ;;  %v220_v37 = vld [vmem:[#allocation7 + $0x1a8] sm:$0xff] }
  0x46   :  { %676 = vmatprep.subr.bf16.mxu1 %v675_v47  ;;  %v693_v38 = vpack.c.bf16 %v281_v36, %v279_v35  ;;  %v222_v39 = vld [vmem:[#allocation7 + $0x1b8] sm:$0xff]  ;;  %v219_v40 = vld [vmem:[#allocation7 + $0x1a0] sm:$0xff]  ;;  %v221_v41 = vld [vmem:[#allocation7 + $0x1b0] sm:$0xff] }
  0x47   :  { %v631_v42 = vpack.c.bf16 %v222_v39, %v220_v37  ;;  %v633_v43 = vpack.c.bf16 %v221_v41, %v219_v40  ;;  %v286_v45 = vld [vmem:[#allocation7 + $0x3b8] sm:$0xff]  ;;  %v283_v46 = vld [vmem:[#allocation7 + $0x3a0] sm:$0xff]  ;;  %v285_v48 = vld [vmem:[#allocation7 + $0x3b0] sm:$0xff] }
  0x48   :  { %614 = vmatpush1.bf16.msra.mxu0 %v613_v44  ;;  %v284_v44 = vld [vmem:[#allocation7 + $0x3a8] sm:$0xff]  ;;  %v697_v51 = vpack.c.bf16 %v285_v48, %v283_v46  ;;  %v225_v54 = vld [vmem:[#allocation7 + $0x1d0] sm:$0xff]  ;;  %v287_v57 = vld [vmem:[#allocation7 + $0x3c0] sm:$0xff] }
  0x49   :  { %678 = vmatpush1.bf16.msra.mxu1 %v677_v50  ;;  %616 = vmatprep.subr.bf16.mxu0 %v615_v53  ;;  %v695_v47 = vpack.c.bf16 %v286_v45, %v284_v44  ;;  %v224_v49 = vld [vmem:[#allocation7 + $0x1c8] sm:$0xff]  ;;  %v226_v50 = vld [vmem:[#allocation7 + $0x1d8] sm:$0xff]  ;;  %v223_v53 = vld [vmem:[#allocation7 + $0x1c0] sm:$0xff]  ;;  %v295_v44 = vstv %s573_s2 }
  0x4a   :  { %680 = vmatprep.subr.bf16.mxu1 %v679_v59  ;;  %v635_v52 = vpack.c.bf16 %v226_v50, %v224_v49  ;;  %v288_v55 = vld [vmem:[#allocation7 + $0x3c8] sm:$0xff]  ;;  %v289_v58 = vld [vmem:[#allocation7 + $0x3d0] sm:$0xff]  ;;  %v637_v59 = vpack.c.bf16 %v225_v54, %v223_v53  ;;  %v227_v63 = vld [vmem:[#allocation7 + $0x1e0] sm:$0xff] }
  0x4b   :  { %v228_v61 = vld [vmem:[#allocation7 + $0x1e8] sm:$0xff]  ;;  %v294_v6 = vld [vmem:[#allocation7 + $0x3f8] sm:$0xff]  ;;  %v293_v11 = vld [vmem:[#allocation7 + $0x3f0] sm:$0xff] }
  0x4c   :  { %618 = vmatpush1.bf16.msra.mxu0 %v617_v56  ;;  %v290_v56 = vld [vmem:[#allocation7 + $0x3d8] sm:$0xff]  ;;  %v292_v5 = vld [vmem:[#allocation7 + $0x3e8] sm:$0xff] }
  0x4d   :  { %682 = vmatpush1.bf16.msra.mxu1 %v681_v62  ;;  %620 = vmatprep.subr.bf16.mxu0 %v619_v4  ;;  %v699_v60 = vpack.c.bf16 %v290_v56, %v288_v55  ;;  %v230_v62 = vld [vmem:[#allocation7 + $0x1f8] sm:$0xff]  ;;  %v229_v4 = vld [vmem:[#allocation7 + $0x1f0] sm:$0xff]  ;;  %v703_v8 = vpack.c.bf16 %v294_v6, %v292_v5 }
  0x4e   :  { %684 = vmatprep.subr.bf16.mxu1 %v683_v10  ;;  %v639_v2 = vpack.c.bf16 %v230_v62, %v228_v61  ;;  %v641_v9 = vpack.c.bf16 %v229_v4, %v227_v63  ;;  %v291_v10 = vld [vmem:[#allocation7 + $0x3e0] sm:$0xff] }
  0x4f   :  { %v705_v12 = vpack.c.bf16 %v293_v11, %v291_v10 }
  0x50   :  { %622 = vmatpush1.bf16.msra.mxu0 %v621_v7  ;;  %v701_v7 = vpack.c.bf16 %v289_v58, %v287_v57 }
  0x51   :  { %686 = vmatpush1.bf16.msra.mxu1 %v685_v13  ;;  %624 = vmatprep.subr.bf16.mxu0 %v623_v16  ;;  %v128_v13 = vstv %s48_s1 }
  0x52   :  { %688 = vmatprep.subr.bf16.mxu1 %v687_v22  ;;  %v157_v22 = vunpack.c.l.s4 %v786_v21 }
  0x54   :  { %626 = vmatpush1.bf16.msra.mxu0 %v625_v19  ;;  %v158_v28 = vunpack.c.0.s8 %v157_v22 }
  0x55   :  { %690 = vmatpush1.bf16.msra.mxu1 %v689_v25  ;;  %628 = vmatprep.subr.bf16.mxu0 %v627_v29  ;;  %v160_v29 = vshrl.u32 %v159_v23, 7 }
  0x56   :  { %692 = vmatprep.subr.bf16.mxu1 %v691_v34 }
  0x57   :  { %v161_v34 = vsub.s32 %v158_v28, %v160_v29 }
  0x58   :  { %630 = vmatpush1.bf16.msra.mxu0 %v629_v33 }
  0x59   :  { %694 = vmatpush1.bf16.msra.mxu1 %v693_v38  ;;  %632 = vmatprep.subr.bf16.mxu0 %v631_v42 }
  0x5a   :  { %696 = vmatprep.subr.bf16.mxu1 %v695_v47 }
  0x5c   :  { %634 = vmatpush1.bf16.msra.mxu0 %v633_v43 }
  0x5d   :  { %636 = vmatprep.subr.bf16.mxu0 %v635_v52  ;;  %698 = vmatpush1.bf16.msra.mxu1 %v697_v51 }
  0x5e   :  { %700 = vmatprep.subr.bf16.mxu1 %v699_v60  ;;  %v468_v60 = vld [vmem:[%s870_s3] sm:$0xff] }
  0x60   :  { %638 = vmatpush1.bf16.msra.mxu0 %v637_v59 }
  0x61   :  { %640 = vmatprep.subr.bf16.mxu0 %v639_v2  ;;  %702 = vmatpush1.bf16.msra.mxu1 %v701_v7 }
  0x62   :  { %704 = vmatprep.subr.bf16.mxu1 %v703_v8 }
  0x64   :  { %642 = vmatpush1.bf16.msra.mxu0 %v641_v9 }
  0x65   :  { %706 = vmatpush1.bf16.msra.mxu1 %v705_v12 }
  0xf8   :  { %v123_v14 = vpop.f32.mrb[0].mxu1 }
  0xf9   :  { %v129_v15 = vadd.f32 %v128_v13, %v123_v14  ;;  %v125_v16 = vpop.f32.mrb[1].mxu1 }
  0xfa   :  { %v130_v17 = vadd.f32 %v128_v13, %v125_v16  ;;  %v143_v18 = vcombine.low %v123_v14, %v125_v16 }
  0xfb   :  { %v131_v19 = vadd.f32 3.0, %v129_v15 }
  0xfc   :  { %v132_v20 = vadd.f32 3.0, %v130_v17  ;;  %575 = vst.sshfl [vmem:[#allocation2] sm:$0x33 pattern:$0x76325410] %v143_v18 }
  0xfd   :  { %v133_v24 = vmax.f32 %v131_v19, 0.0 }
  0xfe   :  { %v134_v25 = vmax.f32 %v132_v20, 0.0 }
  0xff   :  { %v135_v26 = vmin.f32 %v133_v24, 6.0 }
 0x100   :  { %v136_v27 = vmin.f32 %v134_v25, 6.0 }
 0x101   :  { %v137_v30 = vmul.f32 %v135_v26, %v129_v15 }
 0x102   :  { %v138_v31 = vmul.f32 %v136_v27, %v130_v17 }
 0x103   :  { %v139_v32 = vmul.f32 0.16666667, %v137_v30 }
 0x104   :  { %v140_v33 = vmul.f32 0.16666667, %v138_v31 }
 0x106   :  { %v155_v35 = vcombine.low %v139_v32, %v140_v33 }
 0x108   :  { %v162_v36 = vrot.slane %v155_v35, %v161_v34 }
 0x10a   :  { %v163_v37 = vcombine.high %v162_v36, %v162_v36 }
 0x10c   :  { %165 = vst [vmem:[#allocation2 + $0x4] sm:$0xf] %v163_v37 }
 0x113   :  { %v166_v38 = vld [vmem:[#allocation2] sm:$0xff] }
 0x114   :  { %v297_v39 = vcombine.high %v166_v38, %v166_v38  ;;  %v304_v40 = vrot.slane %v166_v38, %v161_v34 }
 0x116   :  { %v312_v41 = vcombine.high %v304_v40, %v304_v40  ;;  %v311_v42 = vrot.slane %v297_v39, %v161_v34 }
 0x118   :  { %382 = vmatprep.mubr.f32.mxu0 %v312_v41  ;;  %v313_v43 = vcombine.high %v311_v42, %v311_v42 }
 0x119   :  { %383 = vmatmul.mubr.f32.vlgmr.msra.gmra.mrb[0].mxu0 %v304_v40 }
 0x11a   :  { %453 = vmatprep.mubr.f32.mxu1 %v313_v43  ;;  %544 = vmatprep.mubr.f32.mxu0 %v785_v3 }
 0x11b   :  { %454 = vmatmul.mubr.f32.vlgmr.msra.gmra.mrb[2].mxu1 %v311_v42 }
 0x1ec   :  { %v384_v45 = vpop.f32.mrb[0].mxu0 }
 0x1ed   :  { %v385_v46 = vadd.f32 %v384_v45, %v295_v44  ;;  %v386_v47 = vpop.f32.mrb[1].mxu0 }
 0x1ee   :  { %v387_v48 = vadd.f32 %v386_v47, %v295_v44  ;;  %v455_v49 = vpop.f32.mrb[2].mxu1 }
 0x1ef   :  { %v456_v50 = vadd.f32 %v455_v49, %v385_v46  ;;  %v457_v51 = vpop.f32.mrb[3].mxu1 }
 0x1f0   :  { %v458_v52 = vadd.f32 %v457_v51, %v387_v48 }
 0x1f1   :  { %v460_v53 = vadd.f32 3.0, %v456_v50 }
 0x1f2   :  { %v461_v54 = vadd.f32 3.0, %v458_v52 }
 0x1f3   :  { %v462_v55 = vmax.f32 %v460_v53, 0.0 }
 0x1f4   :  { %v463_v56 = vmax.f32 %v461_v54, 0.0 }
 0x1f5   :  { %v464_v57 = vmin.f32 %v462_v55, 6.0 }
 0x1f6   :  { %v465_v58 = vmin.f32 %v463_v56, 6.0 }
 0x1f7   :  { %v466_v3 = vmul.f32 0.16666667, %v464_v57 }
 0x1f8   :  { %v467_v59 = vmul.f32 0.16666667, %v465_v58 }
 0x1fa   :  { %576 = vmatprep.subr.msk.mxu0 %vm473_vm1, %v467_v59 }
 0x1fb   :  { %577 = vmatpush1.msk.msra.mxu0 %vm473_vm1, %v466_v3 }
 0x1fc   :  { %578 = vmatmul.mubr.msk.f32.vlgmr.msra.gmra.mrb[2].mxu0 %vm469_vm2, %v468_v60 }
 0x2cf   :  { %v546_v61 = vpop.f32.mrb[2].mxu0 }
 0x2d0   :  { %v553_v62 = vmul.f32 %v546_v61, %v841_v1  ;;  %v548_v63 = vpop.f32.mrb[3].mxu0 }
 0x2d1   :  { %v554_v2 = vmul.f32 %v548_v63, %v836_v0 }
 0x2d2   :  { %555 = vst [vmem:[#allocation8] sm:$0xff] %v553_v62 }
 0x2d3   :  { %556 = vst [vmem:[#allocation8 + $0x8] sm:$0xff] %v554_v2 }
 0x2d4   :  { %764 = shalt.err (!%p761_p3)
}
 0x2d5   :  { %s765_s22 = scalar_lea.hbm %s872_s5, 256 }
 0x2d6   :  { %p766_p4 = scmp.ne.s32.totalorder %s872_s5, %s765_s22  ;;  %p769_p5 = scmp.lt.u32.totalorder %s765_s22, %s872_s5 }
 0x2d8   :  { %p771_p6 = pnand %p769_p5, %p766_p4 }
 0x2da   :  { %774 = shalt.err (!%p771_p6)
}
 0x2db   :  { %566 = dma.vmem_to_hbm [thread:$0]  %s564_s19, 256, %s872_s5, [#allocation5]  }
 0x2dc   :  { %779 = dma.done.wait [#allocation5], 256  }
 0x2dd   :  { %780 = vsyncadd [#allocation5], 4294967040 }
 0x2de   :  { %570 = vsyncpa [#allocation4], 1 }
 0x2df   :  { %571 = vsyncpa [#allocation5], 1 }
 0x2e0   :  { %572 = vsyncpa [#allocation6], 1 }

</bundles_post_ra>
